<compile_context>
chip_gen: v6e
topology: v6e:2x2x1
jax: 0.10.0
libtpu: 0.0.40
codegen_flags: <defaults>
</compile_context>

<pallas_src>
import jax
import jax.numpy as jnp
import numpy as np
from jax.experimental import pallas as pl
from jax.experimental.pallas import tpu as pltpu

CHANNEL = 10     # channel_size in the PyTorch module
K1, S1 = 4, 2    # conv1 kernel / stride (tsteps == 10 branch)
K2, S2 = 2, 1    # conv2 kernel / stride


def _round_up(x, m):
    return ((x + m - 1) // m) * m


# ----------------------------------------------------------------------------
# Fused kernel: 4 dense matmuls per batch block.  All indexing has been folded
# into the weights in the wrapper, so the body is full-block reads, MXU dots
# (bf16 operands, f32 accumulation), bias adds, ReLUs and a lane-dense store.
# ----------------------------------------------------------------------------
def _fused_kernel(x_ref, wbd_ref, be_ref, w1_ref, b1_ref, w2_ref, b2_ref,
                  w3_ref, b3_ref, o_ref):
    f32, bf16 = jnp.float32, jnp.bfloat16

    # encoder Linear(in, 3c) + ReLU applied to all T timesteps at once via a
    # block-diagonal weight: (B, T*in) @ (T*in, T*3c)
    p = jnp.dot(x_ref[...], wbd_ref[...], preferred_element_type=f32)
    p = jnp.maximum(p + be_ref[...], 0.0).astype(bf16)            # (B, T*3c)

    # Conv1d(3c -> 2c, k=4, s=2) + ReLU: all L1 positions in one structured matmul
    h1 = jnp.dot(p, w1_ref[...], preferred_element_type=f32)
    h1 = jnp.maximum(h1 + b1_ref[...], 0.0).astype(bf16)          # (B, L1*2c)

    # Conv1d(2c -> c, k=2, s=1) + ReLU
    h2 = jnp.dot(h1, w2_ref[...], preferred_element_type=f32)
    h2 = jnp.maximum(h2 + b2_ref[...], 0.0).astype(bf16)          # (B, L2*c)

    # channel-major Flatten + Linear(3c, out) + ReLU (W3 columns regrouped and
    # zero-padded to a lane-dense width in the wrapper)
    o = jnp.dot(h2, w3_ref[...], preferred_element_type=f32)
    o_ref[...] = jnp.maximum(o + b3_ref[...], 0.0).astype(o_ref.dtype)


# ----------------------------------------------------------------------------
# Deterministic parameter init (PyTorch-default-style uniform(-1/sqrt(fan_in)))
# ----------------------------------------------------------------------------
def init_params(key, input_size, tsteps, output_size):
    assert tsteps == 10, "this script instantiates the tsteps == 10 branch"
    c = CHANNEL
    ks = jax.random.split(key, 8)

    def lin(kw, kb, fan_in, fan_out):
        bound = 1.0 / np.sqrt(fan_in)
        w = jax.random.uniform(kw, (fan_out, fan_in), jnp.float32, -bound, bound)
        b = jax.random.uniform(kb, (fan_out,), jnp.float32, -bound, bound)
        return w, b

    w_enc, b_enc = lin(ks[0], ks[1], input_size, 3 * c)           # Linear(in, 30)

    bound1 = 1.0 / np.sqrt(3 * c * K1)
    w1 = jax.random.uniform(ks[2], (2 * c, 3 * c, K1), jnp.float32, -bound1, bound1)
    b1 = jax.random.uniform(ks[3], (2 * c,), jnp.float32, -bound1, bound1)

    bound2 = 1.0 / np.sqrt(2 * c * K2)
    w2 = jax.random.uniform(ks[4], (c, 2 * c, K2), jnp.float32, -bound2, bound2)
    b2 = jax.random.uniform(ks[5], (c,), jnp.float32, -bound2, bound2)

    w3, b3 = lin(ks[6], ks[7], 3 * c, output_size)                # Linear(30, out)

    return dict(w_enc=w_enc, b_enc=b_enc, w1=w1, b1=b1, w2=w2, b2=b2,
                w3=w3, b3=b3)


# ----------------------------------------------------------------------------
# Fold encoder / conv / flatten structure into dense block-structured weights.
# ----------------------------------------------------------------------------
def fold_params(params, tsteps=10):
    c = CHANNEL
    T = tsteps
    C3, C2, C1 = 3 * c, 2 * c, c
    L1 = (T - K1) // S1 + 1
    L2 = (L1 - K2) // S2 + 1
    # Tie the folding math to the constants it depends on (perf-review ask).
    assert (T, K1, S1, L1, K2, S2, L2) == (10, 4, 2, 4, 2, 1, 3), \
        "weight folding below assumes the tsteps == 10 conv stack"

    w_enc = params["w_enc"]                                        # (3c, in)
    in_size = w_enc.shape[1]

    # encoder as block-diagonal: Wbd[t*in + i, t*3c + j] = w_enc.T[i, j]
    wbd = jnp.kron(jnp.eye(T, dtype=jnp.float32), w_enc.T)         # (T*in, T*3c)
    be_t = jnp.tile(params["b_enc"], T)[None, :]                   # (1, T*3c)

    # conv1: W1big[t*3c + ci, l*2c + co] = w1[co, ci, t - S1*l] for valid taps
    w1big = jnp.zeros((T * C3, L1 * C2), jnp.float32)
    for l in range(L1):
        for k in range(K1):
            t = S1 * l + k
            w1big = w1big.at[t * C3:(t + 1) * C3,
                             l * C2:(l + 1) * C2].set(params["w1"][:, :, k].T)
    b1_t = jnp.tile(params["b1"], L1)[None, :]                     # (1, L1*2c)

    # conv2: W2big[l*2c + ci, m*c + co] = w2[co, ci, l - m] for valid taps
    w2big = jnp.zeros((L1 * C2, L2 * C1), jnp.float32)
    for m in range(L2):
        for k in range(K2):
            l = m + k
            w2big = w2big.at[l * C2:(l + 1) * C2,
                             m * C1:(m + 1) * C1].set(params["w2"][:, :, k].T)
    b2_t = jnp.tile(params["b2"], L2)[None, :]                     # (1, L2*c)

    # Torch Flatten is channel-major: flat[co*L2 + m] = h2[co, m]; our lanes
    # are position-major (m*c + co), so regroup the W3 columns accordingly:
    #   w3rm[m*c + co, o] = w3[o, co*L2 + m]
    w3 = params["w3"]
    out_size = w3.shape[0]
    w3rm = jnp.transpose(w3.reshape(out_size, C1, L2), (2, 1, 0)).reshape(L2 * C1, out_size)
    b3 = params["b3"][None, :]                                     # (1, out)

    return dict(wbd=wbd, be_t=be_t, w1big=w1big, b1_t=b1_t, w2big=w2big,
                b2_t=b2_t, w3rm=w3rm, b3=b3, in_size=in_size, out_size=out_size)


# ----------------------------------------------------------------------------
# Forward pass (tsteps == 10 branch) — one fused, batch-blocked pallas_call.
# ----------------------------------------------------------------------------
def cnn1d_estimator_forward(params, obs, tsteps=10, block_batch=512):
    assert tsteps == 10, "only the tsteps == 10 branch is implemented"
    # TODO(synk): tsteps == 20 / 50 conv stacks and non-ReLU activation_fn are
    # not implemented here (module default activation assumed to be ReLU).
    nd = obs.shape[0]
    T = tsteps
    folded = fold_params(params, tsteps)
    in_size, out_size = folded["in_size"], folded["out_size"]
    assert obs.shape[1] == T * in_size
    out_pad = _round_up(out_size, 128)          # lane-dense output slab

    # Batch block: multiple of 16 sublanes (bf16-friendly); pad nd up to it.
    B = _round_up(min(block_batch, _round_up(nd, 16)), 16)
    nd_pad = _round_up(nd, B)
    num_blocks = nd_pad // B

    # bf16 storage for inputs / weights / output (f32 accumulation in-kernel);
    # biases stay f32.
    x = obs.astype(jnp.bfloat16)                                  # natural layout, no gather
    if nd_pad != nd:
        x = jnp.pad(x, ((0, nd_pad - nd), (0, 0)))
    wbd = folded["wbd"].astype(jnp.bfloat16)
    w1b = folded["w1big"].astype(jnp.bfloat16)
    w2b = folded["w2big"].astype(jnp.bfloat16)
    w3p = jnp.pad(folded["w3rm"], ((0, 0), (0, out_pad - out_size))).astype(jnp.bfloat16)
    be_t, b1_t, b2_t = folded["be_t"], folded["b1_t"], folded["b2_t"]
    b3_p = jnp.pad(folded["b3"], ((0, 0), (0, out_pad - out_size)))

    out = pl.pallas_call(
        _fused_kernel,
        out_shape=jax.ShapeDtypeStruct((nd_pad, out_pad), jnp.bfloat16),
        grid=(num_blocks,),
        in_specs=[
            pl.BlockSpec((B, T * in_size), lambda n: (n, 0)),     # batch block of obs
            pl.BlockSpec(wbd.shape, lambda n: (0, 0)),            # weights: constant
            pl.BlockSpec(be_t.shape, lambda n: (0, 0)),           # index_maps stay
            pl.BlockSpec(w1b.shape, lambda n: (0, 0)),            # VMEM-resident
            pl.BlockSpec(b1_t.shape, lambda n: (0, 0)),
            pl.BlockSpec(w2b.shape, lambda n: (0, 0)),
            pl.BlockSpec(b2_t.shape, lambda n: (0, 0)),
            pl.BlockSpec(w3p.shape, lambda n: (0, 0)),
            pl.BlockSpec(b3_p.shape, lambda n: (0, 0)),
        ],
        out_specs=pl.BlockSpec((B, out_pad), lambda n: (n, 0)),
        compiler_params=pltpu.CompilerParams(dimension_semantics=("parallel",)),
    )(x, wbd, be_t, w1b, b1_t, w2b, b2_t, w3p, b3_p)

    return out[:nd, :out_size].astype(jnp.float32)


# ----------------------------------------------------------------------------
# Pure-JAX references.
# ----------------------------------------------------------------------------
def reference_forward(params, obs, tsteps=10):
    """Mirrors the PyTorch module semantics in f32 / HIGHEST precision."""
    c = CHANNEL
    nd = obs.shape[0]
    T = tsteps
    input_size = params["w_enc"].shape[1]
    hp = jax.lax.Precision.HIGHEST

    x = obs.reshape(nd * T, input_size)
    proj = jax.nn.relu(jnp.dot(x, params["w_enc"].T, precision=hp) + params["b_enc"])

    x1 = proj.reshape(nd, T, 3 * c).transpose(0, 2, 1)                   # NCL
    dn1 = jax.lax.conv_dimension_numbers(x1.shape, params["w1"].shape,
                                         ("NCH", "OIH", "NCH"))
    h1 = jax.lax.conv_general_dilated(x1, params["w1"], (S1,), "VALID",
                                      dimension_numbers=dn1, precision=hp)
    h1 = jax.nn.relu(h1 + params["b1"][None, :, None])

    dn2 = jax.lax.conv_dimension_numbers(h1.shape, params["w2"].shape,
                                         ("NCH", "OIH", "NCH"))
    h2 = jax.lax.conv_general_dilated(h1, params["w2"], (S2,), "VALID",
                                      dimension_numbers=dn2, precision=hp)
    h2 = jax.nn.relu(h2 + params["b2"][None, :, None])

    flat = h2.reshape(nd, -1)
    out = jax.nn.relu(jnp.dot(flat, params["w3"].T, precision=hp) + params["b3"])
    return out


def folded_reference(folded, obs):
    """Same folded-weight algebra as the kernel, but in f32 / HIGHEST.

    Used to validate the conv-window / flatten folding independently of the
    kernel's bf16 storage & MXU precision.
    """
    hp = jax.lax.Precision.HIGHEST
    relu = jax.nn.relu
    p = relu(jnp.dot(obs, folded["wbd"], precision=hp) + folded["be_t"])
    h1 = relu(jnp.dot(p, folded["w1big"], precision=hp) + folded["b1_t"])
    h2 = relu(jnp.dot(h1, folded["w2big"], precision=hp) + folded["b2_t"])
    return relu(jnp.dot(h2, folded["w3rm"], precision=hp) + folded["b3"])


if __name__ == "__main__":
    key = jax.random.PRNGKey(0)
    nd, T, input_size, output_size = 2, 10, 16, 8

    kp, ko = jax.random.split(key)
    params = init_params(kp, input_size, T, output_size)
    # obs is (nd, T * input_size), matching obs.reshape([nd * T, -1]) in torch.
    obs = jax.random.normal(ko, (nd, T * input_size), jnp.float32)

    fwd = jax.jit(cnn1d_estimator_forward, static_argnames=("tsteps", "block_batch"))
    out = jax.block_until_ready(fwd(params, obs, tsteps=T, block_batch=512))
    assert out.shape == (nd, output_size)

    ref = reference_forward(params, obs, tsteps=T)

    # 1) Tight check of the weight-folding algebra (f32, HIGHEST precision on
    #    both sides; catches any wrong tap/flatten offset independent of bf16).
    folded = fold_params(params, tsteps=T)
    ref_folded = folded_reference(folded, obs)
    np.testing.assert_allclose(np.asarray(ref_folded), np.asarray(ref),
                               rtol=1e-4, atol=1e-5)

    # 2) Kernel vs f32 reference.  The kernel genuinely stores inputs, weights,
    #    intermediates and the output in bf16 (f32 MXU accumulation), so a few
    #    rounds of ~0.4% rounding accumulate; hence the looser tolerance.
    np.testing.assert_allclose(np.asarray(out), np.asarray(ref),
                               rtol=2e-2, atol=2e-2)
    print("KERNEL_OK")
</pallas_src>

<mosaic_0001>
module attributes {stable_mosaic.version = 11 : i64} {
  func.func @_fused_kernel(%arg0: i32, %arg1: memref<16x160xbf16, #tpu.memory_space<vmem>>, %arg2: memref<160x300xbf16, #tpu.memory_space<vmem>>, %arg3: memref<1x300xf32, #tpu.memory_space<vmem>>, %arg4: memref<300x80xbf16, #tpu.memory_space<vmem>>, %arg5: memref<1x80xf32, #tpu.memory_space<vmem>>, %arg6: memref<80x30xbf16, #tpu.memory_space<vmem>>, %arg7: memref<1x30xf32, #tpu.memory_space<vmem>>, %arg8: memref<30x128xbf16, #tpu.memory_space<vmem>>, %arg9: memref<1x128xf32, #tpu.memory_space<vmem>>, %arg10: memref<16x128xbf16, #tpu.memory_space<vmem>>) attributes {dimension_semantics = [#tpu.dimension_semantics<parallel>], iteration_bounds = array<i64: 1>, scalar_prefetch = 0 : i64, scratch_operands = 0 : i64, tpu.core_type = #tpu.core_type<tc>, window_params = [{transform_indices = @transform_0, window_bounds = array<i64: 16, 160>}, {pipeline_mode = #tpu.pipeline_mode<synchronous>, transform_indices = @transform_1, window_bounds = array<i64: 160, 300>}, {pipeline_mode = #tpu.pipeline_mode<synchronous>, transform_indices = @transform_2, window_bounds = array<i64: 1, 300>}, {pipeline_mode = #tpu.pipeline_mode<synchronous>, transform_indices = @transform_3, window_bounds = array<i64: 300, 80>}, {pipeline_mode = #tpu.pipeline_mode<synchronous>, transform_indices = @transform_4, window_bounds = array<i64: 1, 80>}, {pipeline_mode = #tpu.pipeline_mode<synchronous>, transform_indices = @transform_5, window_bounds = array<i64: 80, 30>}, {pipeline_mode = #tpu.pipeline_mode<synchronous>, transform_indices = @transform_6, window_bounds = array<i64: 1, 30>}, {pipeline_mode = #tpu.pipeline_mode<synchronous>, transform_indices = @transform_7, window_bounds = array<i64: 30, 128>}, {pipeline_mode = #tpu.pipeline_mode<synchronous>, transform_indices = @transform_8, window_bounds = array<i64: 1, 128>}, {transform_indices = @transform_9, window_bounds = array<i64: 16, 128>}]} {
    %c0 = arith.constant 0 : index
    %c0_0 = arith.constant 0 : index
    %0 = vector.load %arg1[%c0, %c0_0] : memref<16x160xbf16, #tpu.memory_space<vmem>>, vector<16x160xbf16>
    %c0_1 = arith.constant 0 : index
    %c0_2 = arith.constant 0 : index
    %1 = vector.load %arg2[%c0_1, %c0_2] : memref<160x300xbf16, #tpu.memory_space<vmem>>, vector<160x300xbf16>
    %cst = arith.constant dense<0.000000e+00> : vector<16x300xf32>
    %2 = tpu.matmul %0, %1, %cst {dimension_numbers = #tpu.dot_dimension_numbers<[1], [0], [0], [1], [0, 0, 1, 1], [], []>} : vector<16x160xbf16>, vector<160x300xbf16>, vector<16x300xf32> -> vector<16x300xf32>
    %c0_3 = arith.constant 0 : index
    %c0_4 = arith.constant 0 : index
    %3 = vector.load %arg3[%c0_3, %c0_4] : memref<1x300xf32, #tpu.memory_space<vmem>>, vector<1x300xf32>
    %4 = vector.broadcast %3 : vector<1x300xf32> to vector<16x300xf32>
    %5 = arith.addf %2, %4 : vector<16x300xf32>
    %cst_5 = arith.constant 0.000000e+00 : f32
    %6 = vector.broadcast %cst_5 : f32 to vector<16x300xf32>
    %7 = arith.maximumf %5, %6 : vector<16x300xf32>
    %8 = arith.truncf %7 : vector<16x300xf32> to vector<16x300xbf16>
    %c0_6 = arith.constant 0 : index
    %c0_7 = arith.constant 0 : index
    %9 = vector.load %arg4[%c0_6, %c0_7] : memref<300x80xbf16, #tpu.memory_space<vmem>>, vector<300x80xbf16>
    %cst_8 = arith.constant dense<0.000000e+00> : vector<16x80xf32>
    %10 = tpu.matmul %8, %9, %cst_8 {dimension_numbers = #tpu.dot_dimension_numbers<[1], [0], [0], [1], [0, 0, 1, 1], [], []>} : vector<16x300xbf16>, vector<300x80xbf16>, vector<16x80xf32> -> vector<16x80xf32>
    %c0_9 = arith.constant 0 : index
    %c0_10 = arith.constant 0 : index
    %11 = vector.load %arg5[%c0_9, %c0_10] : memref<1x80xf32, #tpu.memory_space<vmem>>, vector<1x80xf32>
    %12 = vector.broadcast %11 : vector<1x80xf32> to vector<16x80xf32>
    %13 = arith.addf %10, %12 : vector<16x80xf32>
    %cst_11 = arith.constant 0.000000e+00 : f32
    %14 = vector.broadcast %cst_11 : f32 to vector<16x80xf32>
    %15 = arith.maximumf %13, %14 : vector<16x80xf32>
    %16 = arith.truncf %15 : vector<16x80xf32> to vector<16x80xbf16>
    %c0_12 = arith.constant 0 : index
    %c0_13 = arith.constant 0 : index
    %17 = vector.load %arg6[%c0_12, %c0_13] : memref<80x30xbf16, #tpu.memory_space<vmem>>, vector<80x30xbf16>
    %cst_14 = arith.constant dense<0.000000e+00> : vector<16x30xf32>
    %18 = tpu.matmul %16, %17, %cst_14 {dimension_numbers = #tpu.dot_dimension_numbers<[1], [0], [0], [1], [0, 0, 1, 1], [], []>} : vector<16x80xbf16>, vector<80x30xbf16>, vector<16x30xf32> -> vector<16x30xf32>
    %c0_15 = arith.constant 0 : index
    %c0_16 = arith.constant 0 : index
    %19 = vector.load %arg7[%c0_15, %c0_16] : memref<1x30xf32, #tpu.memory_space<vmem>>, vector<1x30xf32>
    %20 = vector.broadcast %19 : vector<1x30xf32> to vector<16x30xf32>
    %21 = arith.addf %18, %20 : vector<16x30xf32>
    %cst_17 = arith.constant 0.000000e+00 : f32
    %22 = vector.broadcast %cst_17 : f32 to vector<16x30xf32>
    %23 = arith.maximumf %21, %22 : vector<16x30xf32>
    %24 = arith.truncf %23 : vector<16x30xf32> to vector<16x30xbf16>
    %c0_18 = arith.constant 0 : index
    %c0_19 = arith.constant 0 : index
    %25 = vector.load %arg8[%c0_18, %c0_19] : memref<30x128xbf16, #tpu.memory_space<vmem>>, vector<30x128xbf16>
    %cst_20 = arith.constant dense<0.000000e+00> : vector<16x128xf32>
    %26 = tpu.matmul %24, %25, %cst_20 {dimension_numbers = #tpu.dot_dimension_numbers<[1], [0], [0], [1], [0, 0, 1, 1], [], []>} : vector<16x30xbf16>, vector<30x128xbf16>, vector<16x128xf32> -> vector<16x128xf32>
    %c0_21 = arith.constant 0 : index
    %c0_22 = arith.constant 0 : index
    %27 = vector.load %arg9[%c0_21, %c0_22] : memref<1x128xf32, #tpu.memory_space<vmem>>, vector<1x128xf32>
    %28 = vector.broadcast %27 : vector<1x128xf32> to vector<16x128xf32>
    %29 = arith.addf %26, %28 : vector<16x128xf32>
    %cst_23 = arith.constant 0.000000e+00 : f32
    %30 = vector.broadcast %cst_23 : f32 to vector<16x128xf32>
    %31 = arith.maximumf %29, %30 : vector<16x128xf32>
    %32 = arith.truncf %31 : vector<16x128xf32> to vector<16x128xbf16>
    %c0_24 = arith.constant 0 : index
    %c0_25 = arith.constant 0 : index
    %33 = vector.load %arg10[%c0_24, %c0_25] : memref<16x128xbf16, #tpu.memory_space<vmem>>, vector<16x128xbf16>
    tpu.vector_store %arg10[%c0_24, %c0_25], %32 {strides = array<i32>} : memref<16x128xbf16, #tpu.memory_space<vmem>>, vector<16x128xbf16>,
    return
  }
  func.func @transform_0(%arg0: i32) -> (i32, i32) {
    %c0_i32 = arith.constant 0 : i32
    %c0_i32_0 = arith.constant 0 : i32
    return %arg0, %c0_i32 : i32, i32
  }
  func.func @transform_1(%arg0: i32) -> (i32, i32) {
    %c0_i32 = arith.constant 0 : i32
    %c0_i32_0 = arith.constant 0 : i32
    %c0_i32_1 = arith.constant 0 : i32
    return %c0_i32, %c0_i32_0 : i32, i32
  }
  func.func @transform_2(%arg0: i32) -> (i32, i32) {
    %c0_i32 = arith.constant 0 : i32
    %c0_i32_0 = arith.constant 0 : i32
    %c0_i32_1 = arith.constant 0 : i32
    return %c0_i32, %c0_i32_0 : i32, i32
  }
  func.func @transform_3(%arg0: i32) -> (i32, i32) {
    %c0_i32 = arith.constant 0 : i32
    %c0_i32_0 = arith.constant 0 : i32
    %c0_i32_1 = arith.constant 0 : i32
    return %c0_i32, %c0_i32_0 : i32, i32
  }
  func.func @transform_4(%arg0: i32) -> (i32, i32) {
    %c0_i32 = arith.constant 0 : i32
    %c0_i32_0 = arith.constant 0 : i32
    %c0_i32_1 = arith.constant 0 : i32
    return %c0_i32, %c0_i32_0 : i32, i32
  }
  func.func @transform_5(%arg0: i32) -> (i32, i32) {
    %c0_i32 = arith.constant 0 : i32
    %c0_i32_0 = arith.constant 0 : i32
    %c0_i32_1 = arith.constant 0 : i32
    return %c0_i32, %c0_i32_0 : i32, i32
  }
  func.func @transform_6(%arg0: i32) -> (i32, i32) {
    %c0_i32 = arith.constant 0 : i32
    %c0_i32_0 = arith.constant 0 : i32
    %c0_i32_1 = arith.constant 0 : i32
    return %c0_i32, %c0_i32_0 : i32, i32
  }
  func.func @transform_7(%arg0: i32) -> (i32, i32) {
    %c0_i32 = arith.constant 0 : i32
    %c0_i32_0 = arith.constant 0 : i32
    %c0_i32_1 = arith.constant 0 : i32
    return %c0_i32, %c0_i32_0 : i32, i32
  }
  func.func @transform_8(%arg0: i32) -> (i32, i32) {
    %c0_i32 = arith.constant 0 : i32
    %c0_i32_0 = arith.constant 0 : i32
    %c0_i32_1 = arith.constant 0 : i32
    return %c0_i32, %c0_i32_0 : i32, i32
  }
  func.func @transform_9(%arg0: i32) -> (i32, i32) {
    %c0_i32 = arith.constant 0 : i32
    %c0_i32_0 = arith.constant 0 : i32
    return %arg0, %c0_i32 : i32, i32
  }
}

</mosaic_0001>

<bundles_post_ra>
// kernel: tile.18
= control target key start
LH: loop header
LB: loop body
LE: loop exit
PB: predicated region body
PF: predicated region fallthrough
CT: control target
= control target key end

     0   :  { %s28_s0 = inlined_call_operand.vmem [shape: f32[30], index: 0, kind: input, shape index: {}]   ;;  %s29_s1 = inlined_call_operand.vmem [shape: f32[10,30], index: 1, kind: output, shape index: {}]  }
   0x1   :  { %v4_v0 = vld [vmem:[%s28_s0] ss:$0 sm:$0xff] }
   0x2   :  { %5 = vst [vmem:[%s29_s1] sm:$0xff] %v4_v0  ;;  %8 = vst [vmem:[%s29_s1 + $0x8] sm:$0xff] %v4_v0 }

// kernel: tile.19
= control target key start
LH: loop header
LB: loop body
LE: loop exit
PB: predicated region body
PF: predicated region fallthrough
CT: control target
= control target key end

     0   :  { %vm9_vm0 = vcmask 64512   ;;  %vm22_vm1 = vcmask 130048   ;;  %s122_s14 = smov 120   ;;  %s123_s15 = smov 90   ;;  %vm3_vm2 = vcmask 244736   ;;  %vm13_vm3 = vcmask 179200   ;;  %s186_s0 = inlined_call_operand.vmem [shape: f32[10,30], index: 0, kind: input, shape index: {}]   ;;  %s187_s1 = inlined_call_operand.vmem [shape: f32[1,300], index: 1, kind: output, shape index: {}]  }
   0x1   :  { %v100_v0 = vld [vmem:[%s186_s0 + $0x4] sm:$0x1]   ;;  %v104_v3 = vld [vmem:[%s186_s0 + $0x3] sm:$0x1]   ;;  %v102_v4 = vld [vmem:[%s186_s0 + $0x8] sm:$0x1]  }
   0x2   :  { %v101_v1 = vld [vmem:[%s186_s0 + $0x4] sm:$0x1]   ;;  %34 = vrot.lane.b32.xlu1 %v104_v3, %s123_s15  ;;  %v103_v5 = vld [vmem:[%s186_s0 + $0x8] sm:$0x1]   ;;  %v105_v7 = vld [vmem:[%s186_s0 + $0x7] sm:$0x1]  }
   0x3   :  { %v10_v2 = vsel %vm9_vm0, %v101_v1, %v100_v0  ;;  %v23_v6 = vsel %vm22_vm1, %v103_v5, %v102_v4  ;;  %s124_s20 = smov 112   ;;  %s125_s21 = smov 82   ;;  %v2_v8 = vld [vmem:[%s186_s0] sm:$0x1]   ;;  %v106_v9 = vld [vmem:[%s186_s0 + $0x2] sm:$0x1]  }
   0x4   :  { %11 = vrot.lane.b32.xlu0 %v10_v2, %s122_s14  ;;  %v107_v10 = vld [vmem:[%s186_s0 + $0x6] sm:$0x1]   ;;  %4 = vst.msk [vmem:[#allocation0] sm:$0x1] %vm3_vm2, %v2_v8   ;;  %s126_s28 = smov 60   ;;  %s127_s29 = smov 52  }
   0x5   :  { %v108_v11 = vld [vmem:[%s186_s0 + $0x1] sm:$0x1]   ;;  %v109_v12 = vld [vmem:[%s186_s0 + $0x5] sm:$0x1]   ;;  %s128_s5 = smov 30   ;;  %s129_s6 = smov 22  }
   0x6   :  { %40 = vrot.lane.b32.xlu1 %v105_v7, %s125_s21  ;;  %v110_v13 = vld [vmem:[%s186_s0 + $0x9] sm:$0x1]   ;;  %s130_s0 = smov 14   ;;  %vm16_vm4 = vcmask 1048512   ;;  %vm36_vm5 = vcmask 982736   ;;  %vm26_vm6 = vcmask 113664  }
   0x7   :  { %vm29_vm7 = vcmask 1048448   ;;  %vm42_vm8 = vcmask 917136   ;;  %vm49_vm9 = vcmask 736736   ;;  %vm55_vm10 = vcmask 671136  }
   0x8   :  { %24 = vrot.lane.b32.xlu0 %v23_v6, %s124_s20  ;;  %vm62_vm11 = vcmask 490736   ;;  %vm68_vm12 = vcmask 425136   ;;  %vm75_vm13 = vcmask 359536  }
   0xa   :  { %53 = vrot.lane.b32.xlu1 %v107_v10, %s127_s29 }
   0xc   :  { %47 = vrot.lane.b32.xlu0 %v106_v9, %s126_s28 }
   0xe   :  { %66 = vrot.lane.b32.xlu1 %v109_v12, %s129_s6 }
  0x10   :  { %60 = vrot.lane.b32.xlu0 %v108_v11, %s128_s5 }
  0x14   :  { %73 = vrot.lane.b32.xlu0 %v110_v13, %s130_s0 }
  0x74   :  { %v35_v15 = vpop.permute.xlu1 %34  }
  0x76   :  { %v12_v14 = vpop.permute.xlu0 %11  }
  0x77   :  { %15 = vst.msk [vmem:[#allocation0 + $0x8] sm:$0x1] %vm13_vm3, %v12_v14  }
  0x78   :  { %17 = vst.msk [vmem:[#allocation0] sm:$0x1] %vm16_vm4, %v12_v14   ;;  %v41_v17 = vpop.permute.xlu1 %40  }
  0x79   :  { %37 = vst.msk [vmem:[#allocation0] sm:$0x1] %vm36_vm5, %v35_v15  }
  0x7a   :  { %v25_v16 = vpop.permute.xlu0 %24  }
  0x7b   :  { %28 = vst.msk [vmem:[#allocation0 + $0x10] sm:$0x1] %vm26_vm6, %v25_v16  }
  0x7c   :  { %31 = vst.msk [vmem:[#allocation0 + $0x8] sm:$0x1] %vm29_vm7, %v25_v16   ;;  %v54_v19 = vpop.permute.xlu1 %53  }
  0x7d   :  { %44 = vst.msk [vmem:[#allocation0 + $0x8] sm:$0x1] %vm42_vm8, %v41_v17  }
  0x7e   :  { %v48_v18 = vpop.permute.xlu0 %47   ;;  %57 = vst.msk [vmem:[#allocation0 + $0x8] sm:$0x1] %vm55_vm10, %v54_v19  }
  0x7f   :  { %50 = vst.msk [vmem:[#allocation0] sm:$0x1] %vm49_vm9, %v48_v18  }
  0x80   :  { %v67_v21 = vpop.permute.xlu1 %66  }
  0x81   :  { %70 = vst.msk [vmem:[#allocation0 + $0x8] sm:$0x1] %vm68_vm12, %v67_v21  }
  0x82   :  { %v61_v20 = vpop.permute.xlu0 %60  }
  0x83   :  { %63 = vst.msk [vmem:[#allocation0] sm:$0x1] %vm62_vm11, %v61_v20  }
  0x86   :  { %v74_v22 = vpop.permute.xlu0 %73  }
  0x87   :  { %77 = vst.msk [vmem:[#allocation0 + $0x10] sm:$0x1] %vm75_vm13, %v74_v22  }
  0x88   :  { %v87_v24 = vld [vmem:[#allocation0 + $0x8] sm:$0x1] }
  0x89   :  { %111 = vst [vmem:[%s187_s1 + $0x1] sm:$0x1] %v87_v24 }
  0x8a   :  { %v82_v23 = vld [vmem:[#allocation0] sm:$0x1] }
  0x8b   :  { %85 = vst [vmem:[%s187_s1] sm:$0x1] %v82_v23 }
  0x8e   :  { %v93_v25 = vld [vmem:[#allocation0 + $0x10] sm:$0x1] }
  0x8f   :  { %112 = vst [vmem:[%s187_s1 + $0x2] sm:$0x1] %v93_v25 }

// kernel: tile.23
= control target key start
LH: loop header
LB: loop body
LE: loop exit
PB: predicated region body
PF: predicated region fallthrough
CT: control target
= control target key end

     0   :  { %s22_s0 = inlined_call_operand.vmem [shape: f32[20], index: 0, kind: input, shape index: {}]   ;;  %s23_s1 = inlined_call_operand.vmem [shape: f32[4,20], index: 1, kind: output, shape index: {}]  }
   0x1   :  { %v4_v0 = vld [vmem:[%s22_s0] ss:$0 sm:$0xff] }
   0x2   :  { %5 = vst [vmem:[%s23_s1] sm:$0xf] %v4_v0 }

// kernel: tile.24
= control target key start
LH: loop header
LB: loop body
LE: loop exit
PB: predicated region body
PF: predicated region fallthrough
CT: control target
= control target key end

     0   :  { %vm8_vm0 = vcmask 162816   ;;  %s40_s8 = smov 20   ;;  %s41_s9 = smov 40   ;;  %vm14_vm1 = vcmask 654816   ;;  %vm20_vm2 = vcmask 490816   ;;  %vm26_vm3 = vcmask 326816   ;;  %s58_s0 = inlined_call_operand.vmem [shape: f32[4,20], index: 0, kind: input, shape index: {}]   ;;  %s59_s1 = inlined_call_operand.vmem [shape: f32[1,80], index: 1, kind: output, shape index: {}]  }
   0x1   :  { %v5_v0 = vld [vmem:[%s58_s0] sm:$0xf]  ;;  %s39_s0 = smov 60  }
   0x2   :  { %6 = vst [vmem:[#allocation1] sm:$0xf] %v5_v0 }
   0x9   :  { %v11_v1 = vld [vmem:[#allocation1 + $0x3] sm:$0x1]   ;;  %v23_v2 = vld [vmem:[#allocation1 + $0x1] sm:$0x1]   ;;  %v7_v3 = vld [vmem:[#allocation1] sm:$0x1]  }
   0xa   :  { %12 = vrot.lane.b32.xlu0 %v11_v1, %s39_s0  ;;  %24 = vrot.lane.b32.xlu1 %v23_v2, %s40_s8  ;;  %v17_v4 = vld [vmem:[#allocation1 + $0x2] sm:$0x1]   ;;  %9 = vst.msk [vmem:[#allocation0] sm:$0x1] %vm8_vm0, %v7_v3  }
   0xe   :  { %18 = vrot.lane.b32.xlu0 %v17_v4, %s41_s9 }
  0x7c   :  { %v13_v5 = vpop.permute.xlu0 %12   ;;  %v25_v6 = vpop.permute.xlu1 %24  }
  0x7d   :  { %15 = vst.msk [vmem:[#allocation0] sm:$0x1] %vm14_vm1, %v13_v5  }
  0x80   :  { %v19_v7 = vpop.permute.xlu0 %18  }
  0x81   :  { %21 = vst.msk [vmem:[#allocation0] sm:$0x1] %vm20_vm2, %v19_v7  }
  0x82   :  { %27 = vst.msk [vmem:[#allocation0] sm:$0x1] %vm26_vm3, %v25_v6  }
  0x89   :  { %v32_v8 = vld [vmem:[#allocation0] sm:$0x1] }
  0x8a   :  { %35 = vst [vmem:[%s59_s1] sm:$0x1] %v32_v8 }

// kernel: tile.28
= control target key start
LH: loop header
LB: loop body
LE: loop exit
PB: predicated region body
PF: predicated region fallthrough
CT: control target
= control target key end

     0   :  { %s22_s0 = inlined_call_operand.vmem [shape: f32[10], index: 0, kind: input, shape index: {}]   ;;  %s23_s1 = inlined_call_operand.vmem [shape: f32[3,10], index: 1, kind: output, shape index: {}]  }
   0x1   :  { %v4_v0 = vld [vmem:[%s22_s0] ss:$0 sm:$0xff] }
   0x2   :  { %5 = vst [vmem:[%s23_s1] sm:$0xf] %v4_v0 }

// kernel: tile.29
= control target key start
LH: loop header
LB: loop body
LE: loop exit
PB: predicated region body
PF: predicated region fallthrough
CT: control target
= control target key end

     0   :  { %vm8_vm0 = vcmask 80896   ;;  %s33_s8 = smov 10   ;;  %vm14_vm1 = vcmask 244896   ;;  %vm20_vm2 = vcmask 162896   ;;  %s50_s0 = inlined_call_operand.vmem [shape: f32[3,10], index: 0, kind: input, shape index: {}]   ;;  %s51_s1 = inlined_call_operand.vmem [shape: f32[1,30], index: 1, kind: output, shape index: {}]  }
   0x1   :  { %v5_v0 = vld [vmem:[%s50_s0] sm:$0xf]  ;;  %s32_s0 = smov 20  }
   0x2   :  { %6 = vst [vmem:[#allocation1] sm:$0xf] %v5_v0 }
   0x9   :  { %v11_v1 = vld [vmem:[#allocation1 + $0x2] sm:$0x1]   ;;  %v7_v2 = vld [vmem:[#allocation1] sm:$0x1]   ;;  %v17_v3 = vld [vmem:[#allocation1 + $0x1] sm:$0x1]  }
   0xa   :  { %12 = vrot.lane.b32.xlu0 %v11_v1, %s32_s0  ;;  %9 = vst.msk [vmem:[#allocation0] sm:$0x1] %vm8_vm0, %v7_v2  }
   0xe   :  { %18 = vrot.lane.b32.xlu0 %v17_v3, %s33_s8 }
  0x7c   :  { %v13_v4 = vpop.permute.xlu0 %12  }
  0x7d   :  { %15 = vst.msk [vmem:[#allocation0] sm:$0x1] %vm14_vm1, %v13_v4  }
  0x80   :  { %v19_v5 = vpop.permute.xlu0 %18  }
  0x81   :  { %21 = vst.msk [vmem:[#allocation0] sm:$0x1] %vm20_vm2, %v19_v5  }
  0x88   :  { %v26_v6 = vld [vmem:[#allocation0] sm:$0x1] }
  0x89   :  { %29 = vst [vmem:[%s51_s1] sm:$0x1] %v26_v6 }

// kernel: cnn1d_estimator_forward.1
= control target key start
LH: loop header
LB: loop body
LE: loop exit
PB: predicated region body
PF: predicated region fallthrough
CT: control target
= control target key end

     0   :  { %v1005_v0 = vmov 0   ;;  %vm261_vm0 = vcmask 261120   ;;  %v1006_v35 = vmov 0.0   ;;  %vm520_vm1 = vcmask 1045504   ;;  %s1273_s1 = inlined_call_operand.vmem [shape: bf16[160,300], index: 1, kind: input, shape index: {}]   ;;  %s1274_s0 = inlined_call_operand.vmem [shape: bf16[16,160], index: 0, kind: input, shape index: {}]   ;;  %s1275_s3 = inlined_call_operand.vmem [shape: bf16[300,80], index: 3, kind: input, shape index: {}]   ;;  %s1276_s2 = inlined_call_operand.vmem [shape: f32[1,300], index: 2, kind: input, shape index: {}]   ;;  %s1277_s5 = inlined_call_operand.vmem [shape: bf16[80,30], index: 5, kind: input, shape index: {}]   ;;  %s1278_s4 = inlined_call_operand.vmem [shape: f32[1,80], index: 4, kind: input, shape index: {}]   ;;  %s1279_s7 = inlined_call_operand.vmem [shape: bf16[30,128], index: 7, kind: input, shape index: {}]   ;;  %s1280_s6 = inlined_call_operand.vmem [shape: f32[1,30], index: 6, kind: input, shape index: {}]   ;;  %s1281_s8 = inlined_call_operand.vmem [shape: f32[1,128], index: 8, kind: input, shape index: {}]   ;;  %s1282_s9 = inlined_call_operand.vmem [shape: bf16[16,128], index: 9, kind: output, shape index: {}]  }
   0x1   :  { %308 = vmatprep.subr.bf16.mxu1 %v1005_v0  ;;  %v936_v1 = vld [vmem:[%s1273_s1 + $0xac] ss:$12 sps:$4 sm:$0xff]   ;;  %v938_v2 = vld [vmem:[%s1273_s1 + $0xb0] ss:$12 sps:$4 sm:$0xff]   ;;  %v939_v3 = vld [vmem:[%s1273_s1 + $0xa8] ss:$12 sps:$4 sm:$0xff]   ;;  %v77_v54 = vlaneseq }
   0x2   :  { %265 = vmatprep.subr.bf16.mxu0 %v936_v1  ;;  %309 = vmatpush1.bf16.msra.mxu1 %v938_v2  ;;  %v940_v4 = vld [vmem:[%s1273_s1 + $0x94] ss:$12 sps:$4 sm:$0xff]   ;;  %v942_v5 = vld [vmem:[%s1273_s1 + $0x98] ss:$12 sps:$4 sm:$0xff]   ;;  %v943_v6 = vld [vmem:[%s1273_s1 + $0x90] ss:$12 sps:$4 sm:$0xff]  }
   0x3   :  { %266 = vmatpush1.bf16.msra.mxu0 %v939_v3  ;;  %310 = vmatprep.subr.bf16.mxu1 %v1005_v0  ;;  %v944_v7 = vld [vmem:[%s1273_s1 + $0x7c] ss:$12 sps:$4 sm:$0xff]   ;;  %v946_v8 = vld [vmem:[%s1273_s1 + $0x80] ss:$12 sps:$4 sm:$0xff]   ;;  %v947_v9 = vld [vmem:[%s1273_s1 + $0x78] ss:$12 sps:$4 sm:$0xff]  }
   0x4   :  { %267 = vmatprep.subr.bf16.mxu0 %v940_v4  ;;  %v948_v10 = vld [vmem:[%s1273_s1 + $0x64] ss:$12 sps:$4 sm:$0xff]   ;;  %v950_v11 = vld [vmem:[%s1273_s1 + $0x68] ss:$12 sps:$4 sm:$0xff]   ;;  %v951_v12 = vld [vmem:[%s1273_s1 + $0x60] ss:$12 sps:$4 sm:$0xff]  }
   0x5   :  { %v952_v13 = vld [vmem:[%s1273_s1 + $0x4c] ss:$12 sps:$4 sm:$0xff]   ;;  %v954_v14 = vld [vmem:[%s1273_s1 + $0x50] ss:$12 sps:$4 sm:$0xff]   ;;  %v955_v15 = vld [vmem:[%s1273_s1 + $0x48] ss:$12 sps:$4 sm:$0xff]  }
   0x6   :  { %311 = vmatpush1.bf16.msra.mxu1 %v942_v5  ;;  %v956_v16 = vld [vmem:[%s1273_s1 + $0x34] ss:$12 sps:$4 sm:$0xff]   ;;  %v958_v17 = vld [vmem:[%s1273_s1 + $0x38] ss:$12 sps:$4 sm:$0xff]   ;;  %v959_v18 = vld [vmem:[%s1273_s1 + $0x30] ss:$12 sps:$4 sm:$0xff]  }
   0x7   :  { %268 = vmatpush1.bf16.msra.mxu0 %v943_v6  ;;  %312 = vmatprep.subr.bf16.mxu1 %v1005_v0  ;;  %v960_v19 = vld [vmem:[%s1273_s1 + $0x1c] ss:$12 sps:$4 sm:$0xff]   ;;  %v962_v20 = vld [vmem:[%s1273_s1 + $0x20] ss:$12 sps:$4 sm:$0xff]   ;;  %v963_v21 = vld [vmem:[%s1273_s1 + $0x18] ss:$12 sps:$4 sm:$0xff]  }
   0x8   :  { %269 = vmatprep.subr.bf16.mxu0 %v944_v7  ;;  %v978_v22 = vld [vmem:[%s1274_s0 + $0x4] ss:$8 sps:$4 sm:$0xff]   ;;  %v966_v24 = vld [vmem:[%s1273_s1 + $0x8] ss:$12 sps:$4 sm:$0xff]   ;;  %v979_v32 = vld [vmem:[%s1275_s3 + $0x78] sm:$0xff]   ;;  %vm1007_vm2 = vmmov 0  }
   0x9   :  { %v964_v23 = vld [vmem:[%s1273_s1 + $0x4] ss:$12 sps:$4 sm:$0xff]   ;;  %824 = vmatprep.mubr.msk.bf16.mxu1 %vm261_vm0, %v978_v22  ;;  %823 = vmatprep.mubr.msk.bf16.mxu0 %vm261_vm0, %v978_v22  ;;  %v967_v25 = vld [vmem:[%s1273_s1] ss:$12 sps:$4 sm:$0xff]   ;;  %v968_v26 = vld [vmem:[%s1273_s1 + $0xdc] ss:$12 sps:$4 sm:$0xff]  }
   0xa   :  { %313 = vmatpush1.bf16.msra.mxu1 %v946_v8  ;;  %v970_v27 = vld [vmem:[%s1273_s1 + $0xe0] ss:$12 sps:$4 sm:$0xff]   ;;  %v971_v28 = vld [vmem:[%s1273_s1 + $0xd8] ss:$12 sps:$4 sm:$0xff]   ;;  %v974_v30 = vld [vmem:[%s1273_s1 + $0xc8] ss:$12 sps:$4 sm:$0xff]  }
   0xb   :  { %270 = vmatpush1.bf16.msra.mxu0 %v947_v9  ;;  %314 = vmatprep.subr.bf16.mxu1 %v1005_v0  ;;  %v972_v29 = vld [vmem:[%s1273_s1 + $0xc4] ss:$12 sps:$4 sm:$0xff]   ;;  %v975_v31 = vld [vmem:[%s1273_s1 + $0xc0] ss:$12 sps:$4 sm:$0xff]   ;;  %v980_v34 = vld [vmem:[%s1275_s3 + $0x38] sm:$0xff]   ;;  %v78_v55 = vshrl.u32 %v77_v54, 7 }
   0xc   :  { %271 = vmatprep.subr.bf16.mxu0 %v948_v10  ;;  %v976_v33 = vld [vmem:[%s1274_s0] ss:$8 sps:$4 sm:$0xff]   ;;  %v981_v36 = vld [vmem:[%s1275_s3 + $0x70] sm:$0xff]   ;;  %v987_v42 = vld [vmem:[%s1275_s3 + $0x58] sm:$0xff]   ;;  %vm516_vm3 = vcmask 359424   ;;  %vm656_vm4 = vcmask 654336  }
   0xd   :  { %v982_v37 = vld [vmem:[%s1275_s3 + $0x30] sm:$0xff]   ;;  %v983_v38 = vld [vmem:[%s1275_s3 + $0x68] sm:$0xff]   ;;  %v985_v40 = vld [vmem:[%s1275_s3 + $0x60] sm:$0xff]   ;;  %v87_v56 = vsub.s32 2, %v78_v55  ;;  %v83_v59 = vsub.s32 1, %v78_v55  ;;  %v79_v60 = vsub.s32 0, %v78_v55 }
   0xe   :  { %315 = vmatpush1.bf16.msra.mxu1 %v950_v11  ;;  %v984_v39 = vld [vmem:[%s1275_s3 + $0x28] sm:$0xff]   ;;  %v986_v41 = vld [vmem:[%s1275_s3 + $0x20] sm:$0xff]   ;;  %v989_v43 = vld [vmem:[%s1275_s3 + $0x90] sm:$0x3f]   ;;  %vm730_vm5 = vcmask 1046528   ;;  %vm726_vm6 = vcmask 244736  }
   0xf   :  { %272 = vmatpush1.bf16.msra.mxu0 %v951_v12  ;;  %316 = vmatprep.subr.bf16.mxu1 %v1005_v0  ;;  %v988_v44 = vld [vmem:[%s1275_s3 + $0x18] sm:$0xff]   ;;  %v522_v45 = vsel %vm520_vm1, %v989_v43, 0  ;;  %v990_v46 = vld [vmem:[%s1275_s3 + $0x50] sm:$0xff]   ;;  %v992_v48 = vld [vmem:[%s1275_s3 + $0x88] sm:$0xff]  }
  0x10   :  { %273 = vmatprep.subr.bf16.mxu0 %v952_v13  ;;  %v991_v47 = vld [vmem:[%s1275_s3 + $0x10] sm:$0xff]   ;;  %v993_v49 = vld [vmem:[%s1275_s3 + $0x48] sm:$0xff]   ;;  %v995_v51 = vld [vmem:[%s1275_s3 + $0x80] sm:$0xff]  }
  0x11   :  { %v994_v50 = vld [vmem:[%s1275_s3 + $0x8] sm:$0xff]   ;;  %v996_v52 = vld [vmem:[%s1275_s3 + $0x40] sm:$0xff]  }
  0x12   :  { %317 = vmatpush1.bf16.msra.mxu1 %v954_v14  ;;  %v997_v53 = vld [vmem:[%s1275_s3] sm:$0xff]  }
  0x13   :  { %274 = vmatpush1.bf16.msra.mxu0 %v955_v15  ;;  %318 = vmatprep.subr.bf16.mxu1 %v1005_v0  ;;  %v75_v57 = vld [vmem:[%s1276_s2] sm:$0x7] }
  0x14   :  { %275 = vmatprep.subr.bf16.mxu0 %v956_v16  ;;  %v88_v58 = vrot.slane %v75_v57, %v87_v56  ;;  %v84_v1 = vrot.slane %v75_v57, %v83_v59  ;;  %v80_v2 = vrot.slane %v75_v57, %v79_v60  ;;  %v998_v22 = vld [vmem:[%s1277_s5 + $0x20] sm:$0xff]  }
  0x16   :  { %319 = vmatpush1.bf16.msra.mxu1 %v958_v17 }
  0x17   :  { %276 = vmatpush1.bf16.msra.mxu0 %v959_v18  ;;  %320 = vmatprep.subr.bf16.mxu1 %v1005_v0 }
  0x18   :  { %277 = vmatprep.subr.bf16.mxu0 %v960_v19 }
  0x1a   :  { %321 = vmatpush1.bf16.msra.mxu1 %v962_v20 }
  0x1b   :  { %278 = vmatpush1.bf16.msra.mxu0 %v963_v21  ;;  %322 = vmatprep.subr.bf16.mxu1 %v1005_v0 }
  0x1c   :  { %279 = vmatprep.subr.bf16.mxu0 %v964_v23  ;;  %v999_v23 = vld [vmem:[%s1277_s5 + $0x18] sm:$0xff]  }
  0x1e   :  { %323 = vmatpush1.bf16.msra.mxu1 %v966_v24  ;;  %v1000_v24 = vld [vmem:[%s1277_s5 + $0x10] sm:$0xff]  }
  0x1f   :  { %280 = vmatpush1.bf16.msra.mxu0 %v967_v25  ;;  %336 = vmatprep.subr.bf16.mxu1 %v1005_v0  ;;  %v1001_v25 = vld [vmem:[%s1277_s5 + $0x8] sm:$0xff]  }
  0x20   :  { %293 = vmatprep.subr.bf16.mxu0 %v968_v26  ;;  %v1002_v26 = vld [vmem:[%s1277_s5] sm:$0xff]  }
  0x22   :  { %337 = vmatpush2.bf16.msra.mxu1 %v970_v27 }
  0x23   :  { %294 = vmatpush2.bf16.msra.mxu0 %v971_v28  ;;  %338 = vmatprep.subr.bf16.mxu1 %v1005_v0 }
  0x24   :  { %295 = vmatprep.subr.bf16.mxu0 %v972_v29 }
  0x26   :  { %339 = vmatpush2.bf16.msra.mxu1 %v974_v30 }
  0x27   :  { %296 = vmatpush2.bf16.msra.mxu0 %v975_v31  ;;  %901 = vmatprep.subr.bf16.mxu1 %v1006_v35  ;;  %v825_v31 = vld [vmem:[%s1278_s4] ss:$0 sm:$0xff] }
  0x28   :  { %866 = vmatprep.subr.bf16.mxu0 %v979_v32 }
  0x29   :  { %341 = vmatmul.mubr.bf16.vlgmr.msra.gmra.mxu1 %v976_v33 }
  0x2a   :  { %298 = vmatmul.mubr.bf16.vlgmr.msra.gmra.mxu0 %v976_v33  ;;  %902 = vmatpush3.bf16.msra.mxu1 %v522_v45 }
  0x2b   :  { %867 = vmatpush3.bf16.msra.mxu0 %v980_v34  ;;  %903 = vmatprep.subr.bf16.mxu1 %v1006_v35 }
  0x2c   :  { %868 = vmatprep.subr.bf16.mxu0 %v981_v36  ;;  %907 = vmatprep.mubr.msk.bf16.mxu1 %vm1007_vm2, %v1006_v35 }
  0x2e   :  { %904 = vmatpush3.bf16.msra.mxu1 %v992_v48  ;;  %v1004_v48 = vld [vmem:[%s1279_s7] sm:$0xff]  }
  0x2f   :  { %869 = vmatpush3.bf16.msra.mxu0 %v982_v37  ;;  %905 = vmatprep.subr.bf16.mxu1 %v1006_v35 }
  0x30   :  { %870 = vmatprep.subr.bf16.mxu0 %v983_v38 }
  0x32   :  { %906 = vmatpush3.bf16.msra.mxu1 %v995_v51 }
  0x33   :  { %871 = vmatpush3.bf16.msra.mxu0 %v984_v39  ;;  %911 = vmatprep.subr.bf16.mxu1 %v1006_v35 }
  0x34   :  { %872 = vmatprep.subr.bf16.mxu0 %v985_v40 }
  0x37   :  { %873 = vmatpush3.bf16.msra.mxu0 %v986_v41 }
  0x38   :  { %874 = vmatprep.subr.bf16.mxu0 %v987_v42 }
  0x3b   :  { %875 = vmatpush3.bf16.msra.mxu0 %v988_v44 }
  0x3c   :  { %876 = vmatprep.subr.bf16.mxu0 %v990_v46  ;;  %v1003_v46 = vld [vmem:[%s1279_s7 + $0x8] sm:$0x7f]  }
  0x3f   :  { %877 = vmatpush3.bf16.msra.mxu0 %v991_v47  ;;  %v732_v47 = vsel %vm730_vm5, %v1003_v46, 0 }
  0x40   :  { %878 = vmatprep.subr.bf16.mxu0 %v993_v49  ;;  %v846_v49 = vld [vmem:[%s1280_s6] ss:$0 sm:$0xff] }
  0x43   :  { %879 = vmatpush3.bf16.msra.mxu0 %v994_v50 }
  0x44   :  { %880 = vmatprep.subr.bf16.mxu0 %v996_v52 }
  0x47   :  { %881 = vmatpush3.bf16.msra.mxu0 %v997_v53 }
  0x48   :  { %925 = vmatprep.subr.bf16.mxu0 %v1006_v35 }
  0xe9   :  { %v342_v61 = vpop.f32.mrf.mxu1 }
  0xea   :  { %v343_v62 = vadd.f32 %v342_v61, %v88_v58  ;;  %v299_v63 = vpop.f32.mrf.mxu0 }
  0xeb   :  { %v344_v0 = vpop.f32.mrf.mxu1  ;;  %v300_v11 = vadd.f32 %v299_v63, %v80_v2 }
  0xec   :  { %v301_v3 = vpop.f32.mrf.mxu0  ;;  %v351_v5 = vmax.f32 %v343_v62, 0.0 }
  0xed   :  { %v345_v4 = vpop.f32.mrf.mxu1  ;;  %v302_v8 = vadd.f32 %v301_v3, %v84_v1  ;;  %v349_v19 = vmax.f32 %v300_v11, 0.0 }
  0xee   :  { %v346_v6 = vadd.f32 %v345_v4, %v88_v58  ;;  %v303_v7 = vpop.f32.mrf.mxu0 }
  0xef   :  { %v304_v9 = vadd.f32 %v303_v7, %v80_v2  ;;  %v347_v10 = vpop.f32.mrf.mxu1  ;;  %v350_v17 = vmax.f32 %v302_v8, 0.0 }
  0xf0   :  { %v354_v12 = vmax.f32 %v346_v6, 0.0  ;;  %v305_v13 = vpop.f32.mrf.mxu0 }
  0xf1   :  { %v306_v14 = vadd.f32 %v305_v13, %v84_v1  ;;  %v352_v16 = vmax.f32 %v304_v9, 0.0 }
  0xf2   :  { %v357_v15 = vpack.c.bf16 %v354_v12, %v351_v5 }
  0xf3   :  { %v353_v18 = vmax.f32 %v306_v14, 0.0  ;;  %v355_v21 = vpack.c.bf16 %v352_v16, %v349_v19 }
  0xf4   :  { %908 = vmatmul.mubr.msk.bf16.vlgmr.msra.gmra.mxu1 %vm516_vm3, %v357_v15 }
  0xf5   :  { %v356_v20 = vpack.c.bf16 %v353_v18, %v350_v17  ;;  %921 = vmatprep.mubr.msk.bf16.mxu1 %vm1007_vm2, %v1006_v35  ;;  %912 = vmatpush3.bf16.msra.mxu1 %v998_v22 }
  0xf6   :  { %913 = vmatprep.subr.bf16.mxu1 %v1006_v35 }
  0xf7   :  { %556 = vmatprep.mubr.bf16.mxu0 %v356_v20 }
  0xf8   :  { %557 = vmatmul.mubr.bf16.vlgmr.msra.gmra.mxu0 %v355_v21 }
  0xf9   :  { %929 = vmatprep.mubr.msk.bf16.mxu0 %vm1007_vm2, %v1006_v35  ;;  %914 = vmatpush3.bf16.msra.mxu1 %v999_v23 }
  0xfa   :  { %915 = vmatprep.subr.bf16.mxu1 %v1006_v35  ;;  %926 = vmatpush3.bf16.msra.mxu0 %v732_v47 }
  0xfb   :  { %927 = vmatprep.subr.bf16.mxu0 %v1006_v35 }
  0xfd   :  { %916 = vmatpush3.bf16.msra.mxu1 %v1000_v24 }
  0xfe   :  { %917 = vmatprep.subr.bf16.mxu1 %v1006_v35  ;;  %928 = vmatpush3.bf16.msra.mxu0 %v1004_v48 }
 0x101   :  { %918 = vmatpush3.bf16.msra.mxu1 %v1001_v25 }
 0x102   :  { %919 = vmatprep.subr.bf16.mxu1 %v1006_v35  ;;  %v853_v35 = vld [vmem:[%s1281_s8] ss:$0 sm:$0xff] }
 0x105   :  { %920 = vmatpush3.bf16.msra.mxu1 %v1002_v26 }
 0x1b4   :  { %v599_v27 = vpop.f32.mrf.mxu1 }
 0x1b6   :  { %v909_v28 = vpop.f32.mrf.mxu1 }
 0x1b8   :  { %v882_v29 = vpop.f32.mrf.mxu0  ;;  %v602_v30 = vpop.f32.mrf.mxu1 }
 0x1ba   :  { %v883_v32 = vpop.f32.mrf.mxu0  ;;  %v910_v33 = vpop.f32.mrf.mxu1 }
 0x1bb   :  { %v884_v34 = vadd.f32 %v883_v32, %v882_v29 }
 0x1bc   :  { %v885_v36 = vpop.f32.mrf.mxu0 }
 0x1bd   :  { %v559_v37 = vadd.f32 %v884_v34, %v825_v31 }
 0x1be   :  { %v886_v38 = vpop.f32.mrf.mxu0 }
 0x1bf   :  { %v887_v39 = vadd.f32 %v886_v38, %v885_v36  ;;  %v600_v40 = vadd.f32 %v599_v27, %v559_v37 }
 0x1c1   :  { %v562_v41 = vadd.f32 %v887_v39, %v825_v31  ;;  %v606_v43 = vmax.f32 %v600_v40, 0.0 }
 0x1c3   :  { %v603_v42 = vadd.f32 %v602_v30, %v562_v41 }
 0x1c5   :  { %v607_v44 = vmax.f32 %v603_v42, 0.0 }
 0x1c7   :  { %v608_v45 = vpack.c.bf16 %v607_v44, %v606_v43 }
 0x1c9   :  { %922 = vmatmul.mubr.msk.bf16.vlgmr.msra.gmra.mxu1 %vm656_vm4, %v608_v45 }
 0x289   :  { %v694_v50 = vpop.f32.mrf.mxu1 }
 0x28a   :  { %v695_v52 = vadd.f32 %v846_v49, %v694_v50 }
 0x28b   :  { %v923_v51 = vpop.f32.mrf.mxu1 }
 0x28c   :  { %v701_v56 = vmax.f32 %v695_v52, 0.0 }
 0x28d   :  { %v697_v53 = vpop.f32.mrf.mxu1 }
 0x28e   :  { %v698_v54 = vadd.f32 %v846_v49, %v697_v53 }
 0x28f   :  { %v924_v55 = vpop.f32.mrf.mxu1 }
 0x290   :  { %v702_v57 = vmax.f32 %v698_v54, 0.0 }
 0x292   :  { %v703_v58 = vpack.c.bf16 %v702_v57, %v701_v56 }
 0x294   :  { %930 = vmatmul.mubr.msk.bf16.vlgmr.msra.gmra.mxu0 %vm726_vm6, %v703_v58 }
 0x354   :  { %v768_v59 = vpop.f32.mrf.mxu0 }
 0x355   :  { %v769_v61 = vadd.f32 %v853_v35, %v768_v59 }
 0x356   :  { %v931_v60 = vpop.f32.mrf.mxu0 }
 0x357   :  { %v775_v1 = vmax.f32 %v769_v61, 0.0 }
 0x358   :  { %v771_v62 = vpop.f32.mrf.mxu0 }
 0x359   :  { %v772_v63 = vadd.f32 %v853_v35, %v771_v62 }
 0x35a   :  { %v932_v0 = vpop.f32.mrf.mxu0 }
 0x35b   :  { %v776_v2 = vmax.f32 %v772_v63, 0.0 }
 0x35d   :  { %v864_v3 = vpack.c.bf16 %v776_v2, %v775_v1 }
 0x35f   :  { %865 = vst [vmem:[%s1282_s9] sm:$0xff] %v864_v3  }

</bundles_post_ra>
